<compile_context>
chip_gen: v7x
topology: tpu7x:2x2x1
jax: 0.10.0
libtpu: 0.0.40
codegen_flags: <defaults>
</compile_context>

<pallas_src>
import functools
import math

import jax
import jax.numpy as jnp
from jax.experimental import pallas as pl
from jax.experimental.pallas import tpu as pltpu


def _round_up(x, n):
    return (x + n - 1) // n * n


def _vmem_caps():
    """Return (physical VMEM bytes, tiling budget, vmem_limit) — generation aware."""
    try:
        info = pltpu.get_tpu_info()
        cap = int(getattr(info, "vmem_capacity_bytes", 0)) or (64 << 20)
    except Exception:
        cap = 64 << 20            # conservative (v7x-sized) fallback
    budget = int(cap * 0.70)      # what the tile picker is allowed to plan for
    limit = int(cap * 0.85)       # what we tell Mosaic (headroom for internal scratch)
    return cap, budget, limit


_GELU_C = math.sqrt(2.0 / math.pi)


def _tile_contrib(x_ref, w1_ref, b1_ref, w2_ref, compute_dtype):
    """f32 partial-output contribution of one (row tile, hidden slab)."""
    x = x_ref[...].astype(compute_dtype)
    # First linear (MXU, f32 accumulation) + bias slab.
    h = jnp.dot(x, w1_ref[...], preferred_element_type=jnp.float32) + b1_ref[...]
    # tanh-approx GELU, identical formula to the PyTorch module; tanh goes to the EUP.
    h2 = h * h
    g = 0.5 * h * (1.0 + jnp.tanh(jnp.float32(_GELU_C) * h * (1.0 + 0.044715 * h2)))
    # Second linear: this hidden slab's contribution, f32 accumulation.
    return jnp.dot(g.astype(compute_dtype), w2_ref[...],
                   preferred_element_type=jnp.float32)


def _ffn_kernel_f32out(x_ref, w1_ref, b1_ref, w2_ref, b2_ref, o_ref, *, compute_dtype):
    # f32 output: accumulate straight into o_ref (no extra acc scratch -> less VMEM).
    j = pl.program_id(1)

    @pl.when(j == 0)
    def _init():
        o_ref[...] = jnp.broadcast_to(b2_ref[...], o_ref.shape)

    o_ref[...] += _tile_contrib(x_ref, w1_ref, b1_ref, w2_ref, compute_dtype)


def _ffn_kernel_acc(x_ref, w1_ref, b1_ref, w2_ref, b2_ref, o_ref, acc_ref, *, compute_dtype):
    # Non-f32 output: keep the running sum in an f32 scratch, cast once at the end.
    j = pl.program_id(1)

    @pl.when(j == 0)
    def _init():
        acc_ref[...] = jnp.zeros_like(acc_ref)

    acc_ref[...] += _tile_contrib(x_ref, w1_ref, b1_ref, w2_ref, compute_dtype)

    @pl.when(j == pl.num_programs(1) - 1)
    def _finalize():
        o_ref[...] = (acc_ref[...] + b2_ref[...]).astype(o_ref.dtype)


def _select_hidden_tile(emb, hidden, w_itemsize, budget):
    """Largest hidden tile (multiple of 128) whose double-buffered W1+W2 blocks fit
    half the budget; th == padded hidden means fully-resident weights."""
    de = _round_up(emb, 128)
    he_full = _round_up(hidden, 128)
    w_budget = budget // 2                      # other half reserved for activations
    cands = []
    for t in (he_full, 512, 256, 128):
        t = _round_up(min(t, he_full), 128)
        if t not in cands:
            cands.append(t)
    for th in cands:                            # largest first
        if 2 * (2 * de * th) * w_itemsize <= w_budget:
            return th
    return cands[-1]


def prepare_ffn_params(w1, b1, w2, b2, *, compute_dtype=jnp.bfloat16, budget=None):
    """Pad/cast the weights once. Hoist this call out of the hot path in real use."""
    emb, hidden = w1.shape
    if budget is None:
        _, budget, _ = _vmem_caps()
    de = _round_up(emb, 128)
    th = _select_hidden_tile(emb, hidden, jnp.dtype(compute_dtype).itemsize, budget)
    he = _round_up(hidden, th)

    def pad2(a, r, c):
        if a.shape == (r, c):
            return a                             # already aligned: no copy in the graph
        return jnp.pad(a, ((0, r - a.shape[0]), (0, c - a.shape[1])))

    # Zero padding is exact: GELU(0) == 0 and zero weight rows/cols contribute nothing.
    w1p = pad2(w1.astype(compute_dtype), de, he)
    w2p = pad2(w2.astype(compute_dtype), he, de)
    b1p = pad2(b1.astype(jnp.float32).reshape(1, hidden), 1, he)   # biases stay f32
    b2p = pad2(b2.astype(jnp.float32).reshape(1, emb), 1, de)
    return dict(w1=w1p, b1=b1p, w2=w2p, b2=b2p, emb=emb, hidden=hidden,
                de=de, he=he, th=th, compute_dtype=compute_dtype)


def feed_forward_prepared(x, params, *, tm_cap=512):
    """x: (batch, seq, emb); params from prepare_ffn_params."""
    batch, seq, emb = x.shape
    assert emb == params["emb"]
    de, he, th = params["de"], params["he"], params["th"]
    compute_dtype = params["compute_dtype"]
    m = batch * seq

    _, budget, vmem_limit = _vmem_caps()
    x_item = jnp.dtype(x.dtype).itemsize
    w_item = jnp.dtype(compute_dtype).itemsize
    out_f32 = (x.dtype == jnp.float32)

    # Row tile: as large as the budget allows, but keep >= 2 tiles when possible so the
    # "parallel" axis can feed both v7x TensorCores (and megacore generally).
    m8 = _round_up(m, 8)
    tm = min(tm_cap, max(8, _round_up((m8 + 1) // 2, 8)))

    w_bytes = 2 * (2 * de * th) * w_item + 2 * (th + de) * 4   # double-buffered blocks

    def act_bytes(tm_e):
        b = 2 * tm_e * de * x_item                 # x tile (double-buffered)
        b += 2 * tm_e * de * x_item                # out tile (double-buffered)
        b += 0 if out_f32 else tm_e * de * 4       # f32 acc scratch (non-f32 out only)
        b += 2 * tm_e * th * 4                     # live hidden intermediate headroom
        return b

    while tm > 8 and w_bytes + act_bytes(tm) > budget:
        tm = max(8, _round_up(tm // 2, 8))

    mp = _round_up(m, tm)
    grid = (mp // tm, he // th)

    x2 = x.reshape(m, emb)
    if (mp, de) != (m, emb):
        x2 = jnp.pad(x2, ((0, mp - m), (0, de - emb)))

    # Weights are fetched once total when resident (grid[1]==1), else once per row tile.
    w_stream = 1 if grid[1] == 1 else grid[0]
    cost = pl.CostEstimate(
        flops=4 * mp * de * he,
        transcendentals=mp * he,
        bytes_accessed=2 * mp * de * x_item + w_stream * 2 * de * he * w_item,
    )

    in_specs = [
        pl.BlockSpec((tm, de), lambda i, j: (i, 0)),   # x row tile
        pl.BlockSpec((de, th), lambda i, j: (0, j)),   # W1 hidden slab
        pl.BlockSpec((1, th), lambda i, j: (0, j)),    # b1 slab
        pl.BlockSpec((th, de), lambda i, j: (j, 0)),   # W2 hidden slab
        pl.BlockSpec((1, de), lambda i, j: (0, 0)),    # b2 (constant)
    ]
    out_spec = pl.BlockSpec((tm, de), lambda i, j: (i, 0))

    if out_f32:
        kernel = functools.partial(_ffn_kernel_f32out, compute_dtype=compute_dtype)
        scratch = []
    else:
        kernel = functools.partial(_ffn_kernel_acc, compute_dtype=compute_dtype)
        scratch = [pltpu.VMEM((tm, de), jnp.float32)]

    out = pl.pallas_call(
        kernel,
        out_shape=jax.ShapeDtypeStruct((mp, de), x.dtype),
        grid_spec=pltpu.PrefetchScalarGridSpec(
            num_scalar_prefetch=0,
            grid=grid,
            in_specs=in_specs,
            out_specs=out_spec,
            scratch_shapes=scratch,
        ),
        compiler_params=pltpu.CompilerParams(
            dimension_semantics=("parallel", "arbitrary"),
            vmem_limit_bytes=vmem_limit,
        ),
        cost_estimate=cost,
    )(x2, params["w1"], params["b1"], params["w2"], params["b2"])

    return out[:m, :emb].reshape(batch, seq, emb)


def feed_forward(x, w1, b1, w2, b2, *, compute_dtype=jnp.bfloat16, tm_cap=512):
    """Convenience wrapper: pads/casts weights per call. In a real model, call
    prepare_ffn_params once and reuse the result with feed_forward_prepared."""
    params = prepare_ffn_params(w1, b1, w2, b2, compute_dtype=compute_dtype)
    return feed_forward_prepared(x, params, tm_cap=tm_cap)


def feed_forward_ref(x, w1, b1, w2, b2):
    """Pure-JAX f32 reference matching the PyTorch module."""
    h = jnp.einsum("bsd,dh->bsh", x, w1) + b1
    g = 0.5 * h * (1.0 + jnp.tanh(jnp.sqrt(2.0 / jnp.pi) * (h + 0.044715 * h ** 3)))
    return jnp.einsum("bsh,hd->bsd", g, w2) + b2


if __name__ == "__main__":
    # cfg = {'emb_dim': 32}  ->  Linear(32, 128), GELU, Linear(128, 32)
    batch, seq, emb = 2, 8, 32
    hidden = 4 * emb

    key = jax.random.PRNGKey(0)
    kx, kw1, kb1, kw2, kb2 = jax.random.split(key, 5)

    x = jax.random.normal(kx, (batch, seq, emb), dtype=jnp.float32)
    # Deterministic synthetic parameters (shapes from nn.Linear in __init__).
    w1 = jax.random.normal(kw1, (emb, hidden), dtype=jnp.float32) * 0.02
    b1 = jax.random.normal(kb1, (hidden,), dtype=jnp.float32) * 0.02
    w2 = jax.random.normal(kw2, (hidden, emb), dtype=jnp.float32) * 0.02
    b2 = jax.random.normal(kb2, (emb,), dtype=jnp.float32) * 0.02

    ref = feed_forward_ref(x, w1, b1, w2, b2)

    # Exact path: f32 MXU matmuls (tight tolerance).
    out_f32 = jax.block_until_ready(
        feed_forward(x, w1, b1, w2, b2, compute_dtype=jnp.float32))
    assert out_f32.shape == (batch, seq, emb)
    assert jnp.allclose(out_f32, ref, atol=1e-4, rtol=1e-4)

    # Fast path (default): bf16 MXU matmuls with f32 accumulation (loosened tolerance).
    out_fast = jax.block_until_ready(feed_forward(x, w1, b1, w2, b2))
    assert out_fast.shape == (batch, seq, emb)
    assert jnp.allclose(out_fast, ref, atol=5e-3, rtol=5e-2)

    print("KERNEL_OK")
</pallas_src>

<mosaic_0001>
module attributes {stable_mosaic.version = 11 : i64} {
  func.func @_ffn_kernel_f32out(%arg0: i32, %arg1: i32, %arg2: memref<8x128xf32, #tpu.memory_space<vmem>>, %arg3: memref<128x128xf32, #tpu.memory_space<vmem>>, %arg4: memref<1x128xf32, #tpu.memory_space<vmem>>, %arg5: memref<128x128xf32, #tpu.memory_space<vmem>>, %arg6: memref<1x128xf32, #tpu.memory_space<vmem>>, %arg7: memref<8x128xf32, #tpu.memory_space<vmem>>) attributes {dimension_semantics = [#tpu.dimension_semantics<parallel>, #tpu.dimension_semantics<arbitrary>], iteration_bounds = array<i64: 2, 1>, scalar_prefetch = 0 : i64, scratch_operands = 0 : i64, tpu.core_type = #tpu.core_type<tc>, window_params = [{transform_indices = @transform_0, window_bounds = array<i64: 8, 128>}, {transform_indices = @transform_1, window_bounds = array<i64: 128, 128>}, {transform_indices = @transform_2, window_bounds = array<i64: 1, 128>}, {transform_indices = @transform_3, window_bounds = array<i64: 128, 128>}, {pipeline_mode = #tpu.pipeline_mode<synchronous>, transform_indices = @transform_4, window_bounds = array<i64: 1, 128>}, {transform_indices = @transform_5, window_bounds = array<i64: 8, 128>}]} {
    %c0_i32 = arith.constant 0 : i32
    %0 = arith.cmpi eq, %arg1, %c0_i32 : i32
    %1 = arith.extui %0 : i1 to i32
    %c0_i32_0 = arith.constant 0 : i32
    %2 = arith.cmpi ne, %1, %c0_i32_0 : i32
    scf.if %2 {
      %c0_18 = arith.constant 0 : index
      %c0_19 = arith.constant 0 : index
      %28 = vector.load %arg6[%c0_18, %c0_19] : memref<1x128xf32, #tpu.memory_space<vmem>>, vector<1x128xf32>
      %29 = vector.shape_cast %28 : vector<1x128xf32> to vector<1x128xf32>
      %30 = vector.broadcast %29 : vector<1x128xf32> to vector<8x128xf32>
      %c0_20 = arith.constant 0 : index
      %c0_21 = arith.constant 0 : index
      %31 = vector.load %arg7[%c0_20, %c0_21] : memref<8x128xf32, #tpu.memory_space<vmem>>, vector<8x128xf32>
      tpu.vector_store %arg7[%c0_20, %c0_21], %30 {strides = array<i32>} : memref<8x128xf32, #tpu.memory_space<vmem>>, vector<8x128xf32>,
    } else {
    }
    %c0 = arith.constant 0 : index
    %c0_1 = arith.constant 0 : index
    %3 = vector.load %arg7[%c0, %c0_1] : memref<8x128xf32, #tpu.memory_space<vmem>>, vector<8x128xf32>
    %c0_2 = arith.constant 0 : index
    %c0_3 = arith.constant 0 : index
    %4 = vector.load %arg2[%c0_2, %c0_3] : memref<8x128xf32, #tpu.memory_space<vmem>>, vector<8x128xf32>
    %c0_4 = arith.constant 0 : index
    %c0_5 = arith.constant 0 : index
    %5 = vector.load %arg3[%c0_4, %c0_5] : memref<128x128xf32, #tpu.memory_space<vmem>>, vector<128x128xf32>
    %cst = arith.constant dense<0.000000e+00> : vector<8x128xf32>
    %6 = tpu.matmul %4, %5, %cst {dimension_numbers = #tpu.dot_dimension_numbers<[1], [0], [0], [1], [0, 0, 1, 1], [], []>} : vector<8x128xf32>, vector<128x128xf32>, vector<8x128xf32> -> vector<8x128xf32>
    %c0_6 = arith.constant 0 : index
    %c0_7 = arith.constant 0 : index
    %7 = vector.load %arg4[%c0_6, %c0_7] : memref<1x128xf32, #tpu.memory_space<vmem>>, vector<1x128xf32>
    %8 = vector.broadcast %7 : vector<1x128xf32> to vector<8x128xf32>
    %9 = arith.addf %6, %8 : vector<8x128xf32>
    %10 = arith.mulf %9, %9 : vector<8x128xf32>
    %cst_8 = arith.constant 5.000000e-01 : f32
    %11 = vector.broadcast %cst_8 : f32 to vector<8x128xf32>
    %12 = arith.mulf %11, %9 : vector<8x128xf32>
    %cst_9 = arith.constant 0.797884583 : f32
    %13 = vector.broadcast %cst_9 : f32 to vector<8x128xf32>
    %14 = arith.mulf %13, %9 : vector<8x128xf32>
    %cst_10 = arith.constant 4.471500e-02 : f32
    %15 = vector.broadcast %cst_10 : f32 to vector<8x128xf32>
    %16 = arith.mulf %15, %10 : vector<8x128xf32>
    %cst_11 = arith.constant 1.000000e+00 : f32
    %17 = vector.broadcast %cst_11 : f32 to vector<8x128xf32>
    %18 = arith.addf %17, %16 : vector<8x128xf32>
    %19 = arith.mulf %14, %18 : vector<8x128xf32>
    %20 = math.tanh %19 : vector<8x128xf32>
    %cst_12 = arith.constant 1.000000e+00 : f32
    %21 = vector.broadcast %cst_12 : f32 to vector<8x128xf32>
    %22 = arith.addf %21, %20 : vector<8x128xf32>
    %23 = arith.mulf %12, %22 : vector<8x128xf32>
    %c0_13 = arith.constant 0 : index
    %c0_14 = arith.constant 0 : index
    %24 = vector.load %arg5[%c0_13, %c0_14] : memref<128x128xf32, #tpu.memory_space<vmem>>, vector<128x128xf32>
    %cst_15 = arith.constant dense<0.000000e+00> : vector<8x128xf32>
    %25 = tpu.matmul %23, %24, %cst_15 {dimension_numbers = #tpu.dot_dimension_numbers<[1], [0], [0], [1], [0, 0, 1, 1], [], []>} : vector<8x128xf32>, vector<128x128xf32>, vector<8x128xf32> -> vector<8x128xf32>
    %26 = arith.addf %3, %25 : vector<8x128xf32>
    %c0_16 = arith.constant 0 : index
    %c0_17 = arith.constant 0 : index
    %27 = vector.load %arg7[%c0_16, %c0_17] : memref<8x128xf32, #tpu.memory_space<vmem>>, vector<8x128xf32>
    tpu.vector_store %arg7[%c0_16, %c0_17], %26 {strides = array<i32>} : memref<8x128xf32, #tpu.memory_space<vmem>>, vector<8x128xf32>,
    return
  }
  func.func @transform_0(%arg0: i32, %arg1: i32) -> (i32, i32) {
    %c0_i32 = arith.constant 0 : i32
    %c0_i32_0 = arith.constant 0 : i32
    return %arg0, %c0_i32 : i32, i32
  }
  func.func @transform_1(%arg0: i32, %arg1: i32) -> (i32, i32) {
    %c0_i32 = arith.constant 0 : i32
    %c0_i32_0 = arith.constant 0 : i32
    return %c0_i32, %arg1 : i32, i32
  }
  func.func @transform_2(%arg0: i32, %arg1: i32) -> (i32, i32) {
    %c0_i32 = arith.constant 0 : i32
    %c0_i32_0 = arith.constant 0 : i32
    return %c0_i32, %arg1 : i32, i32
  }
  func.func @transform_3(%arg0: i32, %arg1: i32) -> (i32, i32) {
    %c0_i32 = arith.constant 0 : i32
    %c0_i32_0 = arith.constant 0 : i32
    return %arg1, %c0_i32 : i32, i32
  }
  func.func @transform_4(%arg0: i32, %arg1: i32) -> (i32, i32) {
    %c0_i32 = arith.constant 0 : i32
    %c0_i32_0 = arith.constant 0 : i32
    %c0_i32_1 = arith.constant 0 : i32
    return %c0_i32, %c0_i32_0 : i32, i32
  }
  func.func @transform_5(%arg0: i32, %arg1: i32) -> (i32, i32) {
    %c0_i32 = arith.constant 0 : i32
    %c0_i32_0 = arith.constant 0 : i32
    return %arg0, %c0_i32 : i32, i32
  }
}

</mosaic_0001>

<bundles_post_ra>
// kernel: tpu_custom_call.1
= control target key start
LH: loop header
LB: loop body
LE: loop exit
PB: predicated region body
PF: predicated region fallthrough
CT: control target
= control target key end

     0   :  { %10 = vsyncpa [#allocation3], 0  ;;  %s1396_s0 = inlined_call_operand.hbm [shape: f32[16,128], index: 0, kind: input, shape index: {}]   ;;  %s1397_s1 = inlined_call_operand.hbm [shape: f32[128,128], index: 1, kind: input, shape index: {}]   ;;  %s1398_s2 = inlined_call_operand.vmem [shape: f32[1,128], index: 2, kind: input, shape index: {}]   ;;  %s1399_s3 = inlined_call_operand.hbm [shape: f32[128,128], index: 3, kind: input, shape index: {}]   ;;  %s1400_s4 = inlined_call_operand.vmem [shape: f32[1,128], index: 4, kind: input, shape index: {}]   ;;  %s1401_s5 = inlined_call_operand.hbm [shape: f32[16,128], index: 5, kind: output, shape index: {}]  }
   0x1   :  { %12 = vsyncpa [#allocation3 + $0x1], 0 }
   0x2   :  { %13 = vsyncpa [#allocation6], 0 }
   0x3   :  { %14 = vsyncpa [#allocation4], 0 }
   0x4   :  { %16 = vsyncpa [#allocation4 + $0x1], 0  ;;  %s1117_s18 = smov 0   ;;  %s1119_s19 = smov 0  }
   0x5   :  { %s1121_s20 = smov 0   ;;  %s1123_s21 = smov 0  }
   0x6   :  { %s1125_s22 = smov 0   ;;  %s1127_s23 = smov 0  }
   0x7 LB: > { %s642_s24 = sadd.s32 4294967295, %s1076_s23   ;;  %s643_s25 = sadd.s32 4294967294, %s1076_s23   ;;  %s1076_s23 = sphi %s1127_s23, %s22_s23   ;;  %s1072_s22 = sphi %s1125_s22, %s1423_s22   ;;  %s1068_s21 = sphi %s1123_s21, %s1422_s21   ;;  %s1064_s20 = sphi %s1121_s20, %s1421_s20   ;;  %s1060_s19 = sphi %s1119_s19, %s1420_s19   ;;  %s1056_s18 = sphi %s1117_s18, %s1419_s18  }
   0x8   : > { %p54_p0 = scmp.ne.s32.totalorder %s1060_s19, %s1056_s18  ;;  %p1151_p1 = scmp.eq.s32.totalorder %s642_s24, 0 }
   0x9   : > { %p1155_p2 = scmp.eq.s32.totalorder %s642_s24, 1  ;;  %p183_p3 = scmp.eq.s32.totalorder %s643_s25, 1 }
   0xa   : > { %s1406_s26 = scalar_select %p1151_p1, 1, 0 }
   0xb   : > { %p1161_p4 = por %p1151_p1, %p54_p0  ;;  %p644_p5 = scmp.ge.s32.totalorder %s1076_s23, 1 }
   0xc   : > { %p1166_p6 = por %p183_p3, %p54_p0  ;;  %p190_p7 = scmp.lt.s32.totalorder %s1076_s23, 3 }
   0xd   : > { %s1408_s28 = scalar_select %p1161_p4, 1, 0 }
   0xe   : > { %s1409_s29 = scalar_select %p1166_p6, 1, 0 }
   0xf   : > { %p1171_p8 = pnand %p644_p5, %p190_p7  ;;  %s1078_s6 = smov [#allocation5]  }
  0x10   : > { %s204_s7 = sshll.u32 %s1078_s6, 4  ;;  %s1079_s9 = smov [#allocation7]   ;;  %s1175_s7 = int_to_ptr.vmem [resolvable:$true] %s204_s7 }
  0x11   : > { %p826_p9 = pneg %p1171_p8  ;;  %s226_s10 = sshll.u32 %s1079_s9, 4  ;;  %s1186_s10 = int_to_ptr.vmem [resolvable:$true] %s226_s10 }
  0x12   : > { %s904_s13 = scalar_lea.hbm %s1397_s1, 2048 }
  0x13   : > { %p1182_p11 = pnand %p826_p9, %p1151_p1  ;;  %p905_p12 = scmp.ne.s32.totalorder %s1397_s1, %s904_s13 }
  0x14   : > { %p911_p5 = scmp.lt.u32.totalorder %s904_s13, %s1397_s1 }
  0x15   : > { %p906_p13 = pneg %p1182_p11 }
  0x17   : > { %p907_p0 = pnand %p906_p13, %p905_p12 }
  0x19   : > { %p908_p3 = pneg %p907_p0 }
  0x1b   : > { %p913_p7 = pnand %p911_p5, %p908_p3 }
  0x1d   : > { %916 = shalt.err (!%p913_p7)
}
  0x1e   : > { %s917_s24 = scalar_lea.vmem %s1175_s7, 2048  ;;  %p925_p1 = scmp.lt.s32.totalorder %s1175_s7, %s1175_s7 }
  0x1f   : > { %p918_p9 = scmp.ne.s32.totalorder %s1175_s7, %s917_s24  ;;  %p926_p12 = scmp.lt.s32.totalorder %s917_s24, %s917_s24 }
  0x21   : > { %p920_p10 = pnand %p918_p9, %p906_p13  ;;  %p927_p0 = por %p926_p12, %p925_p1 }
  0x23   : > { %p921_p6 = pneg %p920_p10 }
  0x25   : > { %p928_p4 = pnand %p927_p0, %p921_p6 }
  0x27   : > { %931 = shalt.err (!%p928_p4)
}
  0x28   : > { %s1080_s25 = smov 128   ;;  %s1081_s6 = smov 8  }
  0x29   : > { %829 = dma.hbm_to_vmem [thread:$0]  (!%p1182_p11), %s1397_s1, 2048, %s1175_s7, [#allocation6], %s1080_s25, %s1080_s25, %s1081_s6  }
  0x2a   : > { %s932_s14 = scalar_lea.hbm %s1399_s3, 2048 }
  0x2b   : > { %p933_p1 = scmp.ne.s32.totalorder %s1399_s3, %s932_s14  ;;  %p939_p10 = scmp.lt.u32.totalorder %s932_s14, %s1399_s3 }
  0x2d   : > { %p935_p4 = pnand %p933_p1, %p906_p13 }
  0x2f   : > { %p936_p6 = pneg %p935_p4 }
  0x31   : > { %p941_p3 = pnand %p939_p10, %p936_p6 }
  0x33   : > { %944 = shalt.err (!%p941_p3)
}
  0x34   : > { %s945_s7 = scalar_lea.vmem %s1186_s10, 2048  ;;  %p953_p12 = scmp.lt.s32.totalorder %s1186_s10, %s1186_s10 }
  0x35   : > { %p946_p5 = scmp.ne.s32.totalorder %s1186_s10, %s945_s7  ;;  %p954_p0 = scmp.lt.s32.totalorder %s945_s7, %s945_s7 }
  0x37   : > { %p948_p7 = pnand %p946_p5, %p906_p13  ;;  %p955_p1 = por %p954_p0, %p953_p12 }
  0x39   : > { %p949_p9 = pneg %p948_p7 }
  0x3b   : > { %p956_p4 = pnand %p955_p1, %p949_p9 }
  0x3d   : > { %959 = shalt.err (!%p956_p4)
}
  0x3e   : > { %832 = dma.hbm_to_vmem [thread:$0]  (!%p1182_p11), %s1399_s3, 2048, %s1186_s10, [#allocation6], %s1080_s25, %s1080_s25, %s1081_s6  }
  0x3f   : > { %s34_s12 = sadd.s32 1, %s1072_s22  ;;  %s41_s13 = sadd.s32 1, %s1064_s20 }
  0x40   : > { %p36_p13 = scmp.ge.s32.totalorder %s34_s12, 2  ;;  %p48_p6 = scmp.ne.s32.totalorder %s1064_s20, %s1060_s19 }
  0x41   : > { %p49_p10 = scmp.eq.s32.totalorder %s1076_s23, 0  ;;  %p843_p3 = scmp.lt.s32.totalorder %s1076_s23, 2 }
  0x42   : > { %s1425_s12 = smov (%p36_p13, %s34_s12), 0  ;;  %p1250_p7 = por %p1155_p2, %p48_p6 }
  0x43   : > { %p50_p5 = por %p49_p10, %p48_p6  ;;  %s38_s14 = ssub.s32 %s1072_s22, %s1425_s12 }
  0x44   : > { %s1412_s8 = scalar_select %p1250_p7, 1, 0 }
  0x45   : > { %s243_s15 = sand.u32 1, %s1064_s20   ;;  %p39_p9 = scmp.eq.s32.totalorder %s38_s14, 0 }
  0x46   : > { %s649_s10 = sshll.u32 %s243_s15, 3  ;;  %s650_s25 = sshll.u32 %s1072_s22, 7 }
  0x47   : > { %s1259_s6 = scalar_select %p39_p9, %s1064_s20, %s41_s13  }
  0x48   : > { %s1264_s24 = scalar_lea.hbm %s1396_s0, %s650_s25  ;;  %s247_s27 = scalar_lea.vmem [#allocation2], %s649_s10 }
  0x49   : > { %s254_s7 = sshll.u32 %s247_s27, 4  ;;  %p1268_p2 = pnand %p843_p3, %p50_p5  ;;  %s1272_s7 = int_to_ptr.vmem [resolvable:$true] %s254_s7 }
  0x4a   : > { %s244_s11 = scalar_lea.sflag [#allocation3], %s243_s15  ;;  %s960_s13 = scalar_lea.hbm %s1264_s24, 128 }
  0x4b   : > { %p961_p11 = scmp.ne.s32.totalorder %s1264_s24, %s960_s13  ;;  %p962_p12 = pneg %p1268_p2 }
  0x4c   : > { %s965_s25 = scalar_lea.hbm %s1396_s0, 256  ;;  %p966_p4 = scmp.lt.u32.totalorder %s1264_s24, %s1396_s0 }
  0x4d   : > { %p963_p0 = pnand %p962_p12, %p961_p11  ;;  %p967_p13 = scmp.lt.u32.totalorder %s965_s25, %s960_s13 }
  0x4e   : > { %p969_p10 = scmp.lt.u32.totalorder %s960_s13, %s1264_s24 }
  0x4f   : > { %p964_p1 = pneg %p963_p0  ;;  %p968_p6 = por %p967_p13, %p966_p4 }
  0x51   : > { %p970_p3 = por %p969_p10, %p968_p6 }
  0x53   : > { %p971_p5 = pnand %p970_p3, %p964_p1 }
  0x55   : > { %974 = shalt.err (!%p971_p5)
}
  0x56   : > { %s975_s15 = scalar_lea.vmem %s1272_s7, 128  ;;  %s1082_s27 = smov [#allocation2]  }
  0x57   : > { %p976_p9 = scmp.ne.s32.totalorder %s1272_s7, %s975_s15  ;;  %s980_s14 = sshll.u32 %s1082_s27, 4  ;;  %s981_s14 = int_to_ptr.vmem [resolvable:$false] %s980_s14 }
  0x58   : > { %s982_s10 = scalar_lea.vmem %s981_s14, 256  ;;  %p983_p7 = scmp.lt.s32.totalorder %s1272_s7, %s981_s14 }
  0x59   : > { %p978_p11 = pnand %p976_p9, %p962_p12  ;;  %p984_p4 = scmp.lt.s32.totalorder %s982_s10, %s975_s15 }
  0x5b   : > { %p979_p0 = pneg %p978_p11  ;;  %p985_p13 = por %p984_p4, %p983_p7 }
  0x5d   : > { %p986_p6 = pnand %p985_p13, %p979_p0 }
  0x5f   : > { %989 = shalt.err (!%p986_p6)
}
  0x60   : > { %836 = dma.hbm_to_vmem [thread:$0]  (!%p1268_p2), %s1264_s24, 128, %s1272_s7, %s244_s11  }
  0x61   : > { %263 = sbr.rel (%p1171_p8) target bundleno = 608 (0x260), region = 40  ;;  %s1302_s13 = sand.u32 (!%p1171_p8), 1, %s1060_s19  }
  0x62   : > { %s652_s25 = sshll.u32 (!%p1171_p8), %s1302_s13, 3  ;;  %s266_s16 = scalar_lea.sflag (!%p1171_p8), [#allocation3], %s1302_s13 }
  0x63   : > { %s1308_s17 = scalar_lea.vmem (!%p1171_p8), [#allocation2], %s652_s25  ;;  %p1414_p7 = scmp.ne.s32.totalorder (!%p1171_p8), %s1408_s28, 0 }
  0x68   : > { %1043 = dma.done.wait (%p1414_p7), %s266_s16, 128  }
  0x69   : > { %1045 = vsyncadd (%p1414_p7), %s266_s16, 4294967168  ;;  %p1415_p2 = scmp.ne.s32.totalorder %s1406_s26, 0 }
  0x6b   : > { %1047 = dma.done.wait (%p1415_p2), [#allocation6], 4096  }
  0x6c   : > { %1049 = vsyncadd (%p1415_p2), [#allocation6], 4294963200  ;;  %v1083_v0 = vmov 0.0|0.0   ;;  %vm1084_vm0 = vmmov 0   ;;  %v1085_v1 = vmov 0.0   ;;  %v325_v2 = vld [vmem:[#allocation5] sm:$0xff] }
  0x6d   : > { %766 = vmatprep.subr.bf16.mxu0 %v1083_v0  ;;  %728 = vmatprep.mubr.msk.f32.mxu0 %vm1084_vm0, %v1085_v1  ;;  %v326_v3 = vld [vmem:[#allocation5 + $0x8] sm:$0xff]  ;;  %v327_v4 = vld [vmem:[#allocation5 + $0x10] sm:$0xff]  ;;  %v328_v6 = vld [vmem:[#allocation5 + $0x18] sm:$0xff]  ;;  %s659_s7 = sshll.u32 %s1068_s21, 7  ;;  %s306_s9 = scalar_lea.vmem [#allocation8], %s652_s25 }
  0x6e   : > { %790 = vmatprep.subr.bf16.mxu1 %v1083_v0  ;;  %763 = vmatprep.mubr.msk.f32.mxu1 %vm1084_vm0, %v1085_v1  ;;  %v767_v5 = vpack.c.bf16 %v326_v3, %v325_v2  ;;  %v770_v7 = vpack.c.bf16 %v328_v6, %v327_v4  ;;  %v329_v8 = vld [vmem:[#allocation5 + $0x20] sm:$0xff]  ;;  %v330_v9 = vld [vmem:[#allocation5 + $0x28] sm:$0xff]  ;;  %v429_v12 = vld [vmem:[#allocation7 + $0x10] sm:$0xff]  ;;  %s529_s11 = sshll.u32 %s306_s9, 4  ;;  %s1347_s14 = scalar_lea.hbm %s1401_s5, %s659_s7  ;;  %s1349_s11 = int_to_ptr.vmem [resolvable:$true] %s529_s11 }
  0x6f   : > { %v427_v10 = vld [vmem:[#allocation7] sm:$0xff]  ;;  %v428_v11 = vld [vmem:[#allocation7 + $0x8] sm:$0xff]  ;;  %v430_v13 = vld [vmem:[#allocation7 + $0x18] sm:$0xff]  ;;  %v773_v14 = vpack.c.bf16 %v330_v9, %v329_v8  ;;  %s516_s10 = scalar_lea.sflag [#allocation4], %s1302_s13  ;;  %s990_s16 = scalar_lea.vmem %s1349_s11, 128 }
  0x70   : > { %768 = vmatpush3.bf16.msra.mxu0 %v767_v5  ;;  %v791_v15 = vpack.c.bf16 %v428_v11, %v427_v10  ;;  %v331_v16 = vld [vmem:[#allocation5 + $0x30] sm:$0xff]  ;;  %v332_v17 = vld [vmem:[#allocation5 + $0x38] sm:$0xff]  ;;  %v794_v18 = vpack.c.bf16 %v430_v13, %v429_v12  ;;  %v333_v20 = vld [vmem:[#allocation5 + $0x40] sm:$0xff]  ;;  %p991_p8 = scmp.ne.s32.totalorder %s1349_s11, %s990_s16  ;;  %p1416_p12 = scmp.ne.s32.totalorder %s1412_s8, 0 }
  0x71   : > { %769 = vmatprep.subr.bf16.mxu0 %v1083_v0  ;;  %v776_v19 = vpack.c.bf16 %v332_v17, %v331_v16  ;;  %v334_v21 = vld [vmem:[#allocation5 + $0x48] sm:$0xff]  ;;  %v335_v23 = vld [vmem:[#allocation5 + $0x50] sm:$0xff]  ;;  %v336_v24 = vld [vmem:[#allocation5 + $0x58] sm:$0xff]  ;;  %s1086_s21 = smov [#allocation8]  }
  0x72   : > { %792 = vmatpush3.bf16.msra.mxu1 %v791_v15  ;;  %v779_v22 = vpack.c.bf16 %v334_v21, %v333_v20  ;;  %v782_v25 = vpack.c.bf16 %v336_v24, %v335_v23  ;;  %v337_v26 = vld [vmem:[#allocation5 + $0x60] sm:$0xff]  ;;  %v338_v27 = vld [vmem:[#allocation5 + $0x68] sm:$0xff]  ;;  %v339_v29 = vld [vmem:[#allocation5 + $0x70] sm:$0xff]  ;;  %p992_p1 = pnand %p991_p8, %p1416_p12  ;;  %s994_s25 = sshll.u32 %s1086_s21, 4  ;;  %s995_s25 = int_to_ptr.vmem [resolvable:$false] %s994_s25 }
  0x73   : > { %793 = vmatprep.subr.bf16.mxu1 %v1083_v0  ;;  %v785_v28 = vpack.c.bf16 %v338_v27, %v337_v26  ;;  %v340_v30 = vld [vmem:[#allocation5 + $0x78] sm:$0xff]  ;;  %v431_v33 = vld [vmem:[#allocation7 + $0x20] sm:$0xff]  ;;  %v432_v34 = vld [vmem:[#allocation7 + $0x28] sm:$0xff]  ;;  %p997_p3 = scmp.lt.s32.totalorder %s1349_s11, %s995_s25 }
  0x74   : > { %771 = vmatpush3.bf16.msra.mxu0 %v770_v7  ;;  %v788_v31 = vpack.c.bf16 %v340_v30, %v339_v29  ;;  %v324_v32 = vld [vmem:[%s1308_s17] sm:$0xff]  ;;  %v797_v35 = vpack.c.bf16 %v432_v34, %v431_v33  ;;  %v435_v39 = vld [vmem:[#allocation7 + $0x40] sm:$0xff]  ;;  %v436_v40 = vld [vmem:[#allocation7 + $0x48] sm:$0xff]  ;;  %p993_p10 = pneg %p992_p1  ;;  %s996_s17 = scalar_lea.vmem %s995_s25, 256 }
  0x75   : > { %772 = vmatprep.subr.bf16.mxu0 %v1083_v0  ;;  %v433_v36 = vld [vmem:[#allocation7 + $0x30] sm:$0xff]  ;;  %v434_v37 = vld [vmem:[#allocation7 + $0x38] sm:$0xff]  ;;  %v803_v41 = vpack.c.bf16 %v436_v40, %v435_v39  ;;  %v439_v45 = vld [vmem:[#allocation7 + $0x60] sm:$0xff]  ;;  %p998_p5 = scmp.lt.s32.totalorder %s996_s17, %s990_s16 }
  0x76   : > { %795 = vmatpush3.bf16.msra.mxu1 %v794_v18  ;;  %v800_v38 = vpack.c.bf16 %v434_v37, %v433_v36  ;;  %v437_v42 = vld [vmem:[#allocation7 + $0x50] sm:$0xff]  ;;  %v438_v43 = vld [vmem:[#allocation7 + $0x58] sm:$0xff]  ;;  %v440_v46 = vld [vmem:[#allocation7 + $0x68] sm:$0xff] }
  0x77   : > { %796 = vmatprep.subr.bf16.mxu1 %v1083_v0  ;;  %v806_v44 = vpack.c.bf16 %v438_v43, %v437_v42  ;;  %v809_v47 = vpack.c.bf16 %v440_v46, %v439_v45  ;;  %v441_v48 = vld [vmem:[#allocation7 + $0x70] sm:$0xff]  ;;  %v442_v49 = vld [vmem:[#allocation7 + $0x78] sm:$0xff]  ;;  %p999_p9 = por %p998_p5, %p997_p3 }
  0x78   : > { %774 = vmatpush3.bf16.msra.mxu0 %v773_v14  ;;  %v812_v50 = vpack.c.bf16 %v442_v49, %v441_v48  ;;  %v657_v51 = vld [vmem:[%s1398_s2] ss:$0 sm:$0xff] }
  0x79   : > { %775 = vmatprep.subr.bf16.mxu0 %v1083_v0  ;;  %p1000_p11 = pnand %p999_p9, %p993_p10 }
  0x7a   : > { %798 = vmatpush3.bf16.msra.mxu1 %v797_v35 }
  0x7b   : > { %799 = vmatprep.subr.bf16.mxu1 %v1083_v0 }
  0x7c   : > { %777 = vmatpush3.bf16.msra.mxu0 %v776_v19 }
  0x7d   : > { %778 = vmatprep.subr.bf16.mxu0 %v1083_v0 }
  0x7e   : > { %801 = vmatpush3.bf16.msra.mxu1 %v800_v38 }
  0x7f   : > { %802 = vmatprep.subr.bf16.mxu1 %v1083_v0 }
  0x80   : > { %780 = vmatpush3.bf16.msra.mxu0 %v779_v22 }
  0x81   : > { %781 = vmatprep.subr.bf16.mxu0 %v1083_v0 }
  0x82   : > { %804 = vmatpush3.bf16.msra.mxu1 %v803_v41 }
  0x83   : > { %805 = vmatprep.subr.bf16.mxu1 %v1083_v0 }
  0x84   : > { %783 = vmatpush3.bf16.msra.mxu0 %v782_v25 }
  0x85   : > { %784 = vmatprep.subr.bf16.mxu0 %v1083_v0 }
  0x86   : > { %807 = vmatpush3.bf16.msra.mxu1 %v806_v44 }
  0x87   : > { %808 = vmatprep.subr.bf16.mxu1 %v1083_v0 }
  0x88   : > { %786 = vmatpush3.bf16.msra.mxu0 %v785_v28 }
  0x89   : > { %787 = vmatprep.subr.bf16.mxu0 %v1083_v0 }
  0x8a   : > { %810 = vmatpush3.bf16.msra.mxu1 %v809_v47 }
  0x8b   : > { %811 = vmatprep.subr.bf16.mxu1 %v1083_v0  ;;  %v656_v0 = vld [vmem:[%s1400_s4] ss:$0 sm:$0xff] }
  0x8c   : > { %789 = vmatpush3.bf16.msra.mxu0 %v788_v31 }
  0x8e   : > { %813 = vmatpush3.bf16.msra.mxu1 %v812_v50 }
  0x8f   : > { %729 = vmatmul.mubr.f32.vlgmr.msra.gmra.mrb[0].mxu0 %v324_v32 }
 0x162   : > { %v414_v52 = vpop.f32.mrb[0].mxu0 }
 0x163   : > { %v415_v53 = vadd.f32 %v657_v51, %v414_v52  ;;  %v730_v54 = vpop.f32.mrb[1].mxu0 }
 0x165   : > { %v418_v55 = vmul.f32 %v415_v53, %v415_v53  ;;  %v420_v57 = vmul.f32 0.7978846, %v415_v53  ;;  %v419_v61 = vmul.f32 0.5, %v415_v53 }
 0x167   : > { %v421_v56 = vmul.f32 0.044715, %v418_v55 }
 0x169   : > { %v422_v58 = vadd.f32 1.0, %v421_v56 }
 0x16b   : > { %v423_v59 = vmul.f32 %v422_v58, %v420_v57 }
 0x16d   : > { %902 = vtanh.f32 %v423_v59 }
 0x177   : > { %v903_v60 = vpop.eup %902 }
 0x178   : > { %v425_v62 = vadd.f32 1.0, %v903_v60 }
 0x17a   : > { %v426_v63 = vmul.f32 %v425_v62, %v419_v61 }
 0x17c   : > { %764 = vmatmul.mubr.f32.vlgmr.msra.gmra.mrb[0].mxu1 %v426_v63 }
 0x24f   : > { %v509_v1 = vpop.f32.mrb[0].mxu1 }
 0x250   : > { %v513_v2 = vadd.f32 %v656_v0, %v509_v1  ;;  %v765_v3 = vpop.f32.mrb[1].mxu1 }
 0x252   : > { %514 = vst [vmem:[%s306_s9] sm:$0xff] %v513_v2 }
 0x253   : > { %1003 = shalt.err (!%p1000_p11)
}
 0x254   : > { %s1004_s13 = scalar_lea.hbm %s1347_s14, 128  ;;  %s1008_s30 = scalar_lea.hbm %s1401_s5, 256 }
 0x255   : > { %p1005_p0 = scmp.ne.s32.totalorder %s1347_s14, %s1004_s13  ;;  %p1009_p6 = scmp.lt.u32.totalorder %s1347_s14, %s1401_s5 }
 0x256   : > { %p1010_p7 = scmp.lt.u32.totalorder %s1008_s30, %s1004_s13  ;;  %p1012_p8 = scmp.lt.u32.totalorder %s1004_s13, %s1347_s14 }
 0x257   : > { %p1006_p4 = pnand %p1005_p0, %p1416_p12 }
 0x258   : > { %p1011_p2 = por %p1010_p7, %p1009_p6 }
 0x259   : > { %p1007_p13 = pneg %p1006_p4 }
 0x25a   : > { %p1013_p1 = por %p1012_p8, %p1011_p2 }
 0x25c   : > { %p1014_p10 = pnand %p1013_p1, %p1007_p13 }
 0x25e   : > { %1017 = shalt.err (!%p1014_p10)
}
 0x25f   : > { %824 = dma.vmem_to_hbm [thread:$0]  (%p1416_p12), %s1349_s11, 128, %s1347_s14, %s516_s10  }
 0x260 PF: > { %s541_s9 = sand.u32 1, %s1056_s18   ;;  %p1417_p3 = scmp.ne.s32.totalorder %s1409_s29, 0 }
 0x261   : > { %p1418_p5 = scmp.ge.s32.totalorder %s1076_s23, 2  ;;  %s542_s15 = scalar_lea.sflag [#allocation4], %s541_s9 }
 0x263   : > { %p838_p9 = pnand %p1418_p5, %p1417_p3 }
 0x265   : > { %1051 = dma.done.wait (!%p838_p9), %s542_s15, 128  }
 0x266   : > { %1053 = vsyncadd (!%p838_p9), %s542_s15, 4294967168  ;;  %s22_s23 = sadd.s32 1, %s1076_s23   ;;  %s1419_s18 = smov %s1060_s19 }
 0x267   : > { %p19_p11 = scmp.ge.s32.totalorder %s22_s23, 4   ;;  %s1420_s19 = smov %s1064_s20 }
 0x268   : > { %s1421_s20 = smov %s1259_s6  ;;  %s1422_s21 = smov %s1072_s22 }
 0x269   : > { %s1423_s22 = smov %s1425_s12  ;;  %21 = sbr.rel (!%p19_p11) target bundleno = 7 (0x7), region = 102 }
 0x270   :  { %547 = vsyncpa [#allocation3], 1 }
 0x271   :  { %549 = vsyncpa [#allocation3 + $0x1], 1 }
 0x272   :  { %550 = vsyncpa [#allocation6], 1 }
 0x273   :  { %551 = vsyncpa [#allocation4], 1 }
 0x274   :  { %553 = vsyncpa [#allocation4 + $0x1], 1 }

</bundles_post_ra>
